<compile_context>
chip_gen: v6e
topology: v6e:2x2x1
jax: 0.10.0
libtpu: 0.0.40
codegen_flags: <defaults>
</compile_context>

<pallas_src>
import numpy as np
import jax
import jax.numpy as jnp
from jax.experimental import pallas as pl
from jax.experimental.pallas import tpu as pltpu

NEG_FILL = -1e20  # torch masked_fill value used by the module


def _make_kernel(num_heads, head_dim, tb, lq, lk, scale, compute_dtype):
    H, D, TB, Lq, Lk = num_heads, head_dim, tb, lq, lk
    inv_scale = 1.0 / float(scale)
    cdt = compute_dtype

    def kernel(lens_ref,                        # SMEM (B,) int32 [scalar prefetch]
               q_ref, k_ref, v_ref,             # (TB*Lq, E) / (TB*Lk, E) cdt
               wq_ref, bq_ref, wk_ref, bk_ref,  # block-diag weights / tiled biases
               wv_ref, bv_ref, wo_ref, bo_ref,  # permutation-folded out weight/bias
               o_ref,                           # (TB*Lq, E) f32
               oc_ref):                         # VMEM scratch (TB*Lq, E) f32
        f32 = jnp.float32

        # Per-head q/k/v projections as ONE wide MXU matmul each (block-diag W).
        Q = jnp.dot(q_ref[...], wq_ref[...], preferred_element_type=f32) + bq_ref[...]
        K = jnp.dot(k_ref[...], wk_ref[...], preferred_element_type=f32) + bk_ref[...]
        V = jnp.dot(v_ref[...], wv_ref[...], preferred_element_type=f32) + bv_ref[...]
        # Fold 1/scale into Q once (scale = num_heads**1/2 == H/2, module quirk).
        Q = Q * f32(inv_scale)

        base = pl.program_id(0) * TB
        col = jax.lax.broadcasted_iota(jnp.int32, (Lq, Lk), 1)
        neg = f32(NEG_FILL)

        for b in range(TB):                     # static unroll; TB is small
            qlo, klo = b * Lq, b * Lk
            kmask = col < lens_ref[base + b]    # key-padding mask built in-kernel
            Qb = Q[qlo:qlo + Lq]
            Kb = K[klo:klo + Lk]
            Vb = V[klo:klo + Lk]
            for h in range(H):                  # H=4: static unroll is fine
                lo = h * D
                Qh = Qb[:, lo:lo + D].astype(cdt)
                Kh = Kb[:, lo:lo + D].astype(cdt)
                Vh = Vb[:, lo:lo + D].astype(cdt)
                # scores: contract head dim of both operands (no transpose)
                s = jax.lax.dot_general(Qh, Kh, (((1,), (1,)), ((), ())),
                                        preferred_element_type=f32)   # (Lq, Lk)
                s = jnp.where(kmask, s, neg)
                s = s - jnp.max(s, axis=-1, keepdims=True)
                p = jnp.exp(s)
                l = jnp.sum(p, axis=-1, keepdims=True)                # (Lq, 1)
                oh = jnp.dot(p.astype(cdt), Vh, preferred_element_type=f32)
                # deferred softmax normalization on the small (Lq, D) tile (EUP)
                oh = oh * pl.reciprocal(l, approx=True)
                oc_ref[qlo:qlo + Lq, lo:lo + D] = oh                  # head-major

        # All heads x all batches of this block: ONE output-projection matmul,
        # then a single dense (TB*Lq, E) store.
        out = jnp.dot(oc_ref[...].astype(cdt), wo_ref[...],
                      preferred_element_type=f32) + bo_ref[...]
        o_ref[...] = out.astype(o_ref.dtype)

    return kernel


def self_attention_forward(q, k, v, key_lengths, params, num_heads,
                           compute_dtype=jnp.bfloat16, batches_per_block=None):
    """q: (B, Lq, E); k, v: (B, Lk, E); key_lengths: (B,) valid key counts.

    Implements the PyTorch SelfAttention.forward for the standard key-padding
    mask case: key positions >= key_lengths[b] behave like `mask == 0`
    (masked_fill with -1e20); every other position is attended.
    """
    # TODO(synk): arbitrary (non key-padding) masks would need a dense int8 mask
    # operand; only padding masks are supported via scalar-prefetched lengths.
    Wq, bq, Wk, bk, Wv, bv, Wo, bo = params
    B, Lq, E = q.shape
    Lk = k.shape[1]
    H = num_heads
    assert E % H == 0
    D = E // H
    # Reproduce the PyTorch precedence quirk: num_heads ** 1 / 2 == num_heads / 2
    scale = float(num_heads) ** 1 / 2

    if batches_per_block is None:
        # Tiny B: collapse fully (per-step overhead dominates).  Larger B: keep
        # >= 2 parallel blocks so both v7x TensorCores get work.
        if B <= 4:
            batches_per_block = B
        else:
            tb = B // 2
            while B % tb:
                tb -= 1
            batches_per_block = tb
    TB = batches_per_block
    assert B % TB == 0
    num_blocks = B // TB
    if num_blocks > 1 and ((TB * Lq) % 8 or (TB * Lk) % 8):
        TB, num_blocks = B, 1  # fall back to one block (sublane alignment)

    f32 = jnp.float32
    cdt = compute_dtype
    eye = jnp.eye(H, dtype=f32)
    # y = x_flat @ blockdiag(W.T) + tile(b)  ==  per-head nn.Linear on (.., H, D)
    wq_bd = jnp.kron(eye, Wq.T.astype(f32)).astype(cdt)          # (E, E)
    wk_bd = jnp.kron(eye, Wk.T.astype(f32)).astype(cdt)
    wv_bd = jnp.kron(eye, Wv.T.astype(f32)).astype(cdt)
    bq_t = jnp.tile(bq.astype(f32), H).reshape(1, E)
    bk_t = jnp.tile(bk.astype(f32), H).reshape(1, E)
    bv_t = jnp.tile(bv.astype(f32), H).reshape(1, E)
    # Fold the 'bqdh' flatten (c = d*H + h) into a head-major output weight:
    # wo_perm[h*D + d, j] = Wo[j, d*H + h]
    wo_perm = Wo.T.astype(f32).reshape(D, H, E).transpose(1, 0, 2).reshape(E, E).astype(cdt)
    bo2 = bo.astype(f32).reshape(1, E)

    q2 = q.reshape(B * Lq, E).astype(cdt)
    k2 = k.reshape(B * Lk, E).astype(cdt)
    v2 = v.reshape(B * Lk, E).astype(cdt)
    lens = key_lengths.astype(jnp.int32)

    # advisory cost estimate
    itemsize = jnp.dtype(cdt).itemsize
    proj_flops = 2 * (B * Lq + 2 * B * Lk) * E * E
    attn_flops = 2 * B * H * (2 * Lq * Lk * D)
    out_flops = 2 * B * Lq * E * E
    flops = int(proj_flops + attn_flops + out_flops)
    transcendentals = int(B * H * Lq * (Lk + 1))     # exp + reciprocal
    bytes_accessed = int(itemsize * (q2.size + k2.size + v2.size + 4 * E * E)
                         + 4 * (4 * E + B * Lq * E) + 4 * B)

    kernel = _make_kernel(H, D, TB, Lq, Lk, scale, cdt)

    out2 = pl.pallas_call(
        kernel,
        out_shape=jax.ShapeDtypeStruct((B * Lq, E), jnp.float32),
        grid_spec=pltpu.PrefetchScalarGridSpec(
            num_scalar_prefetch=1,
            grid=(num_blocks,),
            in_specs=[
                pl.BlockSpec((TB * Lq, E), lambda i, lens: (i, 0)),   # q slab
                pl.BlockSpec((TB * Lk, E), lambda i, lens: (i, 0)),   # k slab
                pl.BlockSpec((TB * Lk, E), lambda i, lens: (i, 0)),   # v slab
                pl.BlockSpec((E, E), lambda i, lens: (0, 0)),         # Wq block-diag
                pl.BlockSpec((1, E), lambda i, lens: (0, 0)),         # bq tiled
                pl.BlockSpec((E, E), lambda i, lens: (0, 0)),         # Wk block-diag
                pl.BlockSpec((1, E), lambda i, lens: (0, 0)),         # bk tiled
                pl.BlockSpec((E, E), lambda i, lens: (0, 0)),         # Wv block-diag
                pl.BlockSpec((1, E), lambda i, lens: (0, 0)),         # bv tiled
                pl.BlockSpec((E, E), lambda i, lens: (0, 0)),         # Wo permuted
                pl.BlockSpec((1, E), lambda i, lens: (0, 0)),         # bo
            ],
            out_specs=pl.BlockSpec((TB * Lq, E), lambda i, lens: (i, 0)),
            scratch_shapes=[pltpu.VMEM((TB * Lq, E), jnp.float32)],
        ),
        compiler_params=pltpu.CompilerParams(
            dimension_semantics=("parallel",)),                       # megacore
        cost_estimate=pl.CostEstimate(
            flops=flops, transcendentals=transcendentals,
            bytes_accessed=bytes_accessed),
    )(lens, q2, k2, v2, wq_bd, bq_t, wk_bd, bk_t, wv_bd, bv_t, wo_perm, bo2)

    return out2.reshape(B, Lq, E)


def reference(q, k, v, mask, Wq, bq, Wk, bk, Wv, bv, Wo, bo, num_heads):
    """Pure-JAX transcription of the PyTorch forward (including its quirks)."""
    B, Lq, E = q.shape
    H = num_heads
    D = E // H
    qh = q.reshape(B, Lq, H, D) @ Wq.T + bq
    kh = k.reshape(B, -1, H, D) @ Wk.T + bk
    vh = v.reshape(B, -1, H, D) @ Wv.T + bv
    att = jnp.einsum('bqhd,bkhd->bhqk', qh, kh)
    att = jnp.where(mask[:, None, :, :] == 0, jnp.float32(NEG_FILL), att)
    att = jax.nn.softmax(att / (num_heads ** 1 / 2), axis=-1)   # precedence quirk
    out = jnp.einsum('bhqv,bvhd->bqdh', att, vh)
    out = out.reshape(B, Lq, H * D)
    return out @ Wo.T + bo


def _linear_params(key, fan_in, fan_out):
    kw, kb = jax.random.split(key)
    bound = 1.0 / np.sqrt(fan_in)
    W = jax.random.uniform(kw, (fan_out, fan_in), jnp.float32, -bound, bound)
    b = jax.random.uniform(kb, (fan_out,), jnp.float32, -bound, bound)
    return W, b


if __name__ == "__main__":
    key = jax.random.PRNGKey(0)
    ks = jax.random.split(key, 7)

    # input_dims=32, num_heads=4 -> per-head dim 8; batch=2, seq=8
    B, L, E, H = 2, 8, 32, 4
    D = E // H

    q = jax.random.normal(ks[0], (B, L, E), jnp.float32)
    k = jax.random.normal(ks[1], (B, L, E), jnp.float32)
    v = jax.random.normal(ks[2], (B, L, E), jnp.float32)

    # key-padding: batch 0 fully valid, batch 1 has 3 padded keys
    key_lengths = jnp.array([L, L - 3], dtype=jnp.int32)
    # dense mask equivalent (what the torch module would consume) for the reference
    mask = (jnp.arange(L)[None, None, :] < key_lengths[:, None, None]).astype(jnp.float32)
    mask = jnp.broadcast_to(mask, (B, L, L))

    Wq, bq = _linear_params(ks[3], D, D)
    Wk, bk = _linear_params(ks[4], D, D)
    Wv, bv = _linear_params(ks[5], D, D)
    Wo, bo = _linear_params(ks[6], H * D, E)
    params = (Wq, bq, Wk, bk, Wv, bv, Wo, bo)

    ref = reference(q, k, v, mask, Wq, bq, Wk, bk, Wv, bv, Wo, bo, H)

    # f32 path: tight check of module semantics (only the EUP approx-reciprocal differs)
    out = self_attention_forward(q, k, v, key_lengths, params, H,
                                 compute_dtype=jnp.float32)
    jax.block_until_ready(out)
    assert out.shape == (B, L, E)
    np.testing.assert_allclose(np.asarray(out), np.asarray(ref), rtol=5e-3, atol=5e-3)

    # bf16 matmul-input path (v6e/v7x MXU throughput); f32 accumulation + softmax
    out_bf16 = self_attention_forward(q, k, v, key_lengths, params, H,
                                      compute_dtype=jnp.bfloat16)
    jax.block_until_ready(out_bf16)
    np.testing.assert_allclose(np.asarray(out_bf16), np.asarray(ref),
                               rtol=5e-2, atol=5e-2)

    print("KERNEL_OK")
</pallas_src>

<mosaic_0001>
module attributes {stable_mosaic.version = 11 : i64} {
  func.func @kernel(%arg0: i32, %arg1: memref<2xi32, #tpu.memory_space<smem>>, %arg2: memref<16x32xf32, #tpu.memory_space<vmem>>, %arg3: memref<16x32xf32, #tpu.memory_space<vmem>>, %arg4: memref<16x32xf32, #tpu.memory_space<vmem>>, %arg5: memref<32x32xf32, #tpu.memory_space<vmem>>, %arg6: memref<1x32xf32, #tpu.memory_space<vmem>>, %arg7: memref<32x32xf32, #tpu.memory_space<vmem>>, %arg8: memref<1x32xf32, #tpu.memory_space<vmem>>, %arg9: memref<32x32xf32, #tpu.memory_space<vmem>>, %arg10: memref<1x32xf32, #tpu.memory_space<vmem>>, %arg11: memref<32x32xf32, #tpu.memory_space<vmem>>, %arg12: memref<1x32xf32, #tpu.memory_space<vmem>>, %arg13: memref<16x32xf32, #tpu.memory_space<vmem>>, %arg14: memref<16x32xf32, #tpu.memory_space<vmem>>) attributes {dimension_semantics = [#tpu.dimension_semantics<parallel>], iteration_bounds = array<i64: 1>, scalar_prefetch = 1 : i64, scratch_operands = 1 : i64, tpu.core_type = #tpu.core_type<tc>, window_params = [{transform_indices = @transform_0, window_bounds = array<i64: 16, 32>}, {transform_indices = @transform_1, window_bounds = array<i64: 16, 32>}, {transform_indices = @transform_2, window_bounds = array<i64: 16, 32>}, {pipeline_mode = #tpu.pipeline_mode<synchronous>, transform_indices = @transform_3, window_bounds = array<i64: 32, 32>}, {pipeline_mode = #tpu.pipeline_mode<synchronous>, transform_indices = @transform_4, window_bounds = array<i64: 1, 32>}, {pipeline_mode = #tpu.pipeline_mode<synchronous>, transform_indices = @transform_5, window_bounds = array<i64: 32, 32>}, {pipeline_mode = #tpu.pipeline_mode<synchronous>, transform_indices = @transform_6, window_bounds = array<i64: 1, 32>}, {pipeline_mode = #tpu.pipeline_mode<synchronous>, transform_indices = @transform_7, window_bounds = array<i64: 32, 32>}, {pipeline_mode = #tpu.pipeline_mode<synchronous>, transform_indices = @transform_8, window_bounds = array<i64: 1, 32>}, {pipeline_mode = #tpu.pipeline_mode<synchronous>, transform_indices = @transform_9, window_bounds = array<i64: 32, 32>}, {pipeline_mode = #tpu.pipeline_mode<synchronous>, transform_indices = @transform_10, window_bounds = array<i64: 1, 32>}, {transform_indices = @transform_11, window_bounds = array<i64: 16, 32>}]} {
    %c0 = arith.constant 0 : index
    %c0_0 = arith.constant 0 : index
    %0 = vector.load %arg2[%c0, %c0_0] : memref<16x32xf32, #tpu.memory_space<vmem>>, vector<16x32xf32>
    %c0_1 = arith.constant 0 : index
    %c0_2 = arith.constant 0 : index
    %1 = vector.load %arg5[%c0_1, %c0_2] : memref<32x32xf32, #tpu.memory_space<vmem>>, vector<32x32xf32>
    %cst = arith.constant dense<0.000000e+00> : vector<16x32xf32>
    %2 = tpu.matmul %0, %1, %cst {dimension_numbers = #tpu.dot_dimension_numbers<[1], [0], [0], [1], [0, 0, 1, 1], [], []>} : vector<16x32xf32>, vector<32x32xf32>, vector<16x32xf32> -> vector<16x32xf32>
    %c0_3 = arith.constant 0 : index
    %c0_4 = arith.constant 0 : index
    %3 = vector.load %arg6[%c0_3, %c0_4] : memref<1x32xf32, #tpu.memory_space<vmem>>, vector<1x32xf32>
    %4 = vector.broadcast %3 : vector<1x32xf32> to vector<16x32xf32>
    %5 = arith.addf %2, %4 : vector<16x32xf32>
    %c0_5 = arith.constant 0 : index
    %c0_6 = arith.constant 0 : index
    %6 = vector.load %arg3[%c0_5, %c0_6] : memref<16x32xf32, #tpu.memory_space<vmem>>, vector<16x32xf32>
    %c0_7 = arith.constant 0 : index
    %c0_8 = arith.constant 0 : index
    %7 = vector.load %arg7[%c0_7, %c0_8] : memref<32x32xf32, #tpu.memory_space<vmem>>, vector<32x32xf32>
    %cst_9 = arith.constant dense<0.000000e+00> : vector<16x32xf32>
    %8 = tpu.matmul %6, %7, %cst_9 {dimension_numbers = #tpu.dot_dimension_numbers<[1], [0], [0], [1], [0, 0, 1, 1], [], []>} : vector<16x32xf32>, vector<32x32xf32>, vector<16x32xf32> -> vector<16x32xf32>
    %c0_10 = arith.constant 0 : index
    %c0_11 = arith.constant 0 : index
    %9 = vector.load %arg8[%c0_10, %c0_11] : memref<1x32xf32, #tpu.memory_space<vmem>>, vector<1x32xf32>
    %10 = vector.broadcast %9 : vector<1x32xf32> to vector<16x32xf32>
    %11 = arith.addf %8, %10 : vector<16x32xf32>
    %c0_12 = arith.constant 0 : index
    %c0_13 = arith.constant 0 : index
    %12 = vector.load %arg4[%c0_12, %c0_13] : memref<16x32xf32, #tpu.memory_space<vmem>>, vector<16x32xf32>
    %c0_14 = arith.constant 0 : index
    %c0_15 = arith.constant 0 : index
    %13 = vector.load %arg9[%c0_14, %c0_15] : memref<32x32xf32, #tpu.memory_space<vmem>>, vector<32x32xf32>
    %cst_16 = arith.constant dense<0.000000e+00> : vector<16x32xf32>
    %14 = tpu.matmul %12, %13, %cst_16 {dimension_numbers = #tpu.dot_dimension_numbers<[1], [0], [0], [1], [0, 0, 1, 1], [], []>} : vector<16x32xf32>, vector<32x32xf32>, vector<16x32xf32> -> vector<16x32xf32>
    %c0_17 = arith.constant 0 : index
    %c0_18 = arith.constant 0 : index
    %15 = vector.load %arg10[%c0_17, %c0_18] : memref<1x32xf32, #tpu.memory_space<vmem>>, vector<1x32xf32>
    %16 = vector.broadcast %15 : vector<1x32xf32> to vector<16x32xf32>
    %17 = arith.addf %14, %16 : vector<16x32xf32>
    %cst_19 = arith.constant 5.000000e-01 : f32
    %18 = vector.broadcast %cst_19 : f32 to vector<16x32xf32>
    %19 = arith.mulf %5, %18 : vector<16x32xf32>
    %c2_i32 = arith.constant 2 : i32
    %20 = arith.muli %arg0, %c2_i32 : i32
    %21 = tpu.iota {dimensions = array<i32: 1>} : vector<8x8xi32>
    %c0_i32 = arith.constant 0 : i32
    %22 = arith.addi %20, %c0_i32 : i32
    %23 = arith.index_cast %22 : i32 to index
    %24 = memref.load %arg1[%23] : memref<2xi32, #tpu.memory_space<smem>>
    %25 = vector.broadcast %24 : i32 to vector<8x8xi32>
    %26 = arith.cmpi slt, %21, %25 : vector<8x8xi32>
    %27 = vector.extract_strided_slice %19 {offsets = [0, 0], sizes = [8, 32], strides = [1, 1]} : vector<16x32xf32> to vector<8x32xf32>
    %28 = vector.extract_strided_slice %11 {offsets = [0, 0], sizes = [8, 32], strides = [1, 1]} : vector<16x32xf32> to vector<8x32xf32>
    %29 = vector.extract_strided_slice %17 {offsets = [0, 0], sizes = [8, 32], strides = [1, 1]} : vector<16x32xf32> to vector<8x32xf32>
    %30 = vector.extract_strided_slice %27 {offsets = [0, 0], sizes = [8, 8], strides = [1, 1]} : vector<8x32xf32> to vector<8x8xf32>
    %31 = vector.extract_strided_slice %28 {offsets = [0, 0], sizes = [8, 8], strides = [1, 1]} : vector<8x32xf32> to vector<8x8xf32>
    %32 = vector.extract_strided_slice %29 {offsets = [0, 0], sizes = [8, 8], strides = [1, 1]} : vector<8x32xf32> to vector<8x8xf32>
    %cst_20 = arith.constant dense<0.000000e+00> : vector<8x8xf32>
    %33 = tpu.matmul %30, %31, %cst_20 {dimension_numbers = #tpu.dot_dimension_numbers<[1], [1], [0], [0], [0, 0, 1, 0], [], []>} : vector<8x8xf32>, vector<8x8xf32>, vector<8x8xf32> -> vector<8x8xf32>
    %cst_21 = arith.constant -1.000000e+20 : f32
    %34 = vector.broadcast %cst_21 : f32 to vector<8x8xf32>
    %35 = arith.select %26, %33, %34 : vector<8x8xi1>, vector<8x8xf32>
    %cst_22 = arith.constant dense<0xFF800000> : vector<8xf32>
    %36 = vector.multi_reduction <maximumf>, %35, %cst_22 [1] : vector<8x8xf32> to vector<8xf32>
    %37 = vector.shape_cast %36 : vector<8xf32> to vector<8x1xf32>
    %38 = vector.broadcast %37 : vector<8x1xf32> to vector<8x8xf32>
    %39 = arith.subf %35, %38 : vector<8x8xf32>
    %40 = math.exp %39 : vector<8x8xf32>
    %cst_23 = arith.constant dense<0.000000e+00> : vector<8xf32>
    %41 = vector.multi_reduction <add>, %40, %cst_23 [1] : vector<8x8xf32> to vector<8xf32>
    %42 = vector.shape_cast %41 : vector<8xf32> to vector<8x1xf32>
    %cst_24 = arith.constant dense<0.000000e+00> : vector<8x8xf32>
    %43 = tpu.matmul %40, %32, %cst_24 {dimension_numbers = #tpu.dot_dimension_numbers<[1], [0], [0], [1], [0, 0, 1, 1], [], []>} : vector<8x8xf32>, vector<8x8xf32>, vector<8x8xf32> -> vector<8x8xf32>
    %44 = tpu.reciprocal %42 {approx = true} : vector<8x1xf32> -> vector<8x1xf32>
    %45 = vector.broadcast %44 : vector<8x1xf32> to vector<8x8xf32>
    %46 = arith.mulf %43, %45 : vector<8x8xf32>
    %c0_25 = arith.constant 0 : index
    %c0_26 = arith.constant 0 : index
    %47 = vector.load %arg14[%c0_25, %c0_26] : memref<16x32xf32, #tpu.memory_space<vmem>>, vector<8x8xf32>
    tpu.vector_store %arg14[%c0_25, %c0_26], %46 {strides = array<i32>} : memref<16x32xf32, #tpu.memory_space<vmem>>, vector<8x8xf32>,
    %48 = vector.extract_strided_slice %27 {offsets = [0, 8], sizes = [8, 8], strides = [1, 1]} : vector<8x32xf32> to vector<8x8xf32>
    %49 = vector.extract_strided_slice %28 {offsets = [0, 8], sizes = [8, 8], strides = [1, 1]} : vector<8x32xf32> to vector<8x8xf32>
    %50 = vector.extract_strided_slice %29 {offsets = [0, 8], sizes = [8, 8], strides = [1, 1]} : vector<8x32xf32> to vector<8x8xf32>
    %cst_27 = arith.constant dense<0.000000e+00> : vector<8x8xf32>
    %51 = tpu.matmul %48, %49, %cst_27 {dimension_numbers = #tpu.dot_dimension_numbers<[1], [1], [0], [0], [0, 0, 1, 0], [], []>} : vector<8x8xf32>, vector<8x8xf32>, vector<8x8xf32> -> vector<8x8xf32>
    %cst_28 = arith.constant -1.000000e+20 : f32
    %52 = vector.broadcast %cst_28 : f32 to vector<8x8xf32>
    %53 = arith.select %26, %51, %52 : vector<8x8xi1>, vector<8x8xf32>
    %cst_29 = arith.constant dense<0xFF800000> : vector<8xf32>
    %54 = vector.multi_reduction <maximumf>, %53, %cst_29 [1] : vector<8x8xf32> to vector<8xf32>
    %55 = vector.shape_cast %54 : vector<8xf32> to vector<8x1xf32>
    %56 = vector.broadcast %55 : vector<8x1xf32> to vector<8x8xf32>
    %57 = arith.subf %53, %56 : vector<8x8xf32>
    %58 = math.exp %57 : vector<8x8xf32>
    %cst_30 = arith.constant dense<0.000000e+00> : vector<8xf32>
    %59 = vector.multi_reduction <add>, %58, %cst_30 [1] : vector<8x8xf32> to vector<8xf32>
    %60 = vector.shape_cast %59 : vector<8xf32> to vector<8x1xf32>
    %cst_31 = arith.constant dense<0.000000e+00> : vector<8x8xf32>
    %61 = tpu.matmul %58, %50, %cst_31 {dimension_numbers = #tpu.dot_dimension_numbers<[1], [0], [0], [1], [0, 0, 1, 1], [], []>} : vector<8x8xf32>, vector<8x8xf32>, vector<8x8xf32> -> vector<8x8xf32>
    %62 = tpu.reciprocal %60 {approx = true} : vector<8x1xf32> -> vector<8x1xf32>
    %63 = vector.broadcast %62 : vector<8x1xf32> to vector<8x8xf32>
    %64 = arith.mulf %61, %63 : vector<8x8xf32>
    %c0_32 = arith.constant 0 : index
    %c8 = arith.constant 8 : index
    %65 = vector.load %arg14[%c0_32, %c8] : memref<16x32xf32, #tpu.memory_space<vmem>>, vector<8x8xf32>
    tpu.vector_store %arg14[%c0_32, %c8], %64 {strides = array<i32>} : memref<16x32xf32, #tpu.memory_space<vmem>>, vector<8x8xf32>,
    %66 = vector.extract_strided_slice %27 {offsets = [0, 16], sizes = [8, 8], strides = [1, 1]} : vector<8x32xf32> to vector<8x8xf32>
    %67 = vector.extract_strided_slice %28 {offsets = [0, 16], sizes = [8, 8], strides = [1, 1]} : vector<8x32xf32> to vector<8x8xf32>
    %68 = vector.extract_strided_slice %29 {offsets = [0, 16], sizes = [8, 8], strides = [1, 1]} : vector<8x32xf32> to vector<8x8xf32>
    %cst_33 = arith.constant dense<0.000000e+00> : vector<8x8xf32>
    %69 = tpu.matmul %66, %67, %cst_33 {dimension_numbers = #tpu.dot_dimension_numbers<[1], [1], [0], [0], [0, 0, 1, 0], [], []>} : vector<8x8xf32>, vector<8x8xf32>, vector<8x8xf32> -> vector<8x8xf32>
    %cst_34 = arith.constant -1.000000e+20 : f32
    %70 = vector.broadcast %cst_34 : f32 to vector<8x8xf32>
    %71 = arith.select %26, %69, %70 : vector<8x8xi1>, vector<8x8xf32>
    %cst_35 = arith.constant dense<0xFF800000> : vector<8xf32>
    %72 = vector.multi_reduction <maximumf>, %71, %cst_35 [1] : vector<8x8xf32> to vector<8xf32>
    %73 = vector.shape_cast %72 : vector<8xf32> to vector<8x1xf32>
    %74 = vector.broadcast %73 : vector<8x1xf32> to vector<8x8xf32>
    %75 = arith.subf %71, %74 : vector<8x8xf32>
    %76 = math.exp %75 : vector<8x8xf32>
    %cst_36 = arith.constant dense<0.000000e+00> : vector<8xf32>
    %77 = vector.multi_reduction <add>, %76, %cst_36 [1] : vector<8x8xf32> to vector<8xf32>
    %78 = vector.shape_cast %77 : vector<8xf32> to vector<8x1xf32>
    %cst_37 = arith.constant dense<0.000000e+00> : vector<8x8xf32>
    %79 = tpu.matmul %76, %68, %cst_37 {dimension_numbers = #tpu.dot_dimension_numbers<[1], [0], [0], [1], [0, 0, 1, 1], [], []>} : vector<8x8xf32>, vector<8x8xf32>, vector<8x8xf32> -> vector<8x8xf32>
    %80 = tpu.reciprocal %78 {approx = true} : vector<8x1xf32> -> vector<8x1xf32>
    %81 = vector.broadcast %80 : vector<8x1xf32> to vector<8x8xf32>
    %82 = arith.mulf %79, %81 : vector<8x8xf32>
    %c0_38 = arith.constant 0 : index
    %c16 = arith.constant 16 : index
    %83 = vector.load %arg14[%c0_38, %c16] : memref<16x32xf32, #tpu.memory_space<vmem>>, vector<8x8xf32>
    tpu.vector_store %arg14[%c0_38, %c16], %82 {strides = array<i32>} : memref<16x32xf32, #tpu.memory_space<vmem>>, vector<8x8xf32>,
    %84 = vector.extract_strided_slice %27 {offsets = [0, 24], sizes = [8, 8], strides = [1, 1]} : vector<8x32xf32> to vector<8x8xf32>
    %85 = vector.extract_strided_slice %28 {offsets = [0, 24], sizes = [8, 8], strides = [1, 1]} : vector<8x32xf32> to vector<8x8xf32>
    %86 = vector.extract_strided_slice %29 {offsets = [0, 24], sizes = [8, 8], strides = [1, 1]} : vector<8x32xf32> to vector<8x8xf32>
    %cst_39 = arith.constant dense<0.000000e+00> : vector<8x8xf32>
    %87 = tpu.matmul %84, %85, %cst_39 {dimension_numbers = #tpu.dot_dimension_numbers<[1], [1], [0], [0], [0, 0, 1, 0], [], []>} : vector<8x8xf32>, vector<8x8xf32>, vector<8x8xf32> -> vector<8x8xf32>
    %cst_40 = arith.constant -1.000000e+20 : f32
    %88 = vector.broadcast %cst_40 : f32 to vector<8x8xf32>
    %89 = arith.select %26, %87, %88 : vector<8x8xi1>, vector<8x8xf32>
    %cst_41 = arith.constant dense<0xFF800000> : vector<8xf32>
    %90 = vector.multi_reduction <maximumf>, %89, %cst_41 [1] : vector<8x8xf32> to vector<8xf32>
    %91 = vector.shape_cast %90 : vector<8xf32> to vector<8x1xf32>
    %92 = vector.broadcast %91 : vector<8x1xf32> to vector<8x8xf32>
    %93 = arith.subf %89, %92 : vector<8x8xf32>
    %94 = math.exp %93 : vector<8x8xf32>
    %cst_42 = arith.constant dense<0.000000e+00> : vector<8xf32>
    %95 = vector.multi_reduction <add>, %94, %cst_42 [1] : vector<8x8xf32> to vector<8xf32>
    %96 = vector.shape_cast %95 : vector<8xf32> to vector<8x1xf32>
    %cst_43 = arith.constant dense<0.000000e+00> : vector<8x8xf32>
    %97 = tpu.matmul %94, %86, %cst_43 {dimension_numbers = #tpu.dot_dimension_numbers<[1], [0], [0], [1], [0, 0, 1, 1], [], []>} : vector<8x8xf32>, vector<8x8xf32>, vector<8x8xf32> -> vector<8x8xf32>
    %98 = tpu.reciprocal %96 {approx = true} : vector<8x1xf32> -> vector<8x1xf32>
    %99 = vector.broadcast %98 : vector<8x1xf32> to vector<8x8xf32>
    %100 = arith.mulf %97, %99 : vector<8x8xf32>
    %c0_44 = arith.constant 0 : index
    %c24 = arith.constant 24 : index
    %101 = vector.load %arg14[%c0_44, %c24] : memref<16x32xf32, #tpu.memory_space<vmem>>, vector<8x8xf32>
    tpu.vector_store %arg14[%c0_44, %c24], %100 {strides = array<i32>} : memref<16x32xf32, #tpu.memory_space<vmem>>, vector<8x8xf32>,
    %c1_i32 = arith.constant 1 : i32
    %102 = arith.addi %20, %c1_i32 : i32
    %103 = arith.index_cast %102 : i32 to index
    %104 = memref.load %arg1[%103] : memref<2xi32, #tpu.memory_space<smem>>
    %105 = vector.broadcast %104 : i32 to vector<8x8xi32>
    %106 = arith.cmpi slt, %21, %105 : vector<8x8xi32>
    %107 = vector.extract_strided_slice %19 {offsets = [8, 0], sizes = [8, 32], strides = [1, 1]} : vector<16x32xf32> to vector<8x32xf32>
    %108 = vector.extract_strided_slice %11 {offsets = [8, 0], sizes = [8, 32], strides = [1, 1]} : vector<16x32xf32> to vector<8x32xf32>
    %109 = vector.extract_strided_slice %17 {offsets = [8, 0], sizes = [8, 32], strides = [1, 1]} : vector<16x32xf32> to vector<8x32xf32>
    %110 = vector.extract_strided_slice %107 {offsets = [0, 0], sizes = [8, 8], strides = [1, 1]} : vector<8x32xf32> to vector<8x8xf32>
    %111 = vector.extract_strided_slice %108 {offsets = [0, 0], sizes = [8, 8], strides = [1, 1]} : vector<8x32xf32> to vector<8x8xf32>
    %112 = vector.extract_strided_slice %109 {offsets = [0, 0], sizes = [8, 8], strides = [1, 1]} : vector<8x32xf32> to vector<8x8xf32>
    %cst_45 = arith.constant dense<0.000000e+00> : vector<8x8xf32>
    %113 = tpu.matmul %110, %111, %cst_45 {dimension_numbers = #tpu.dot_dimension_numbers<[1], [1], [0], [0], [0, 0, 1, 0], [], []>} : vector<8x8xf32>, vector<8x8xf32>, vector<8x8xf32> -> vector<8x8xf32>
    %cst_46 = arith.constant -1.000000e+20 : f32
    %114 = vector.broadcast %cst_46 : f32 to vector<8x8xf32>
    %115 = arith.select %106, %113, %114 : vector<8x8xi1>, vector<8x8xf32>
    %cst_47 = arith.constant dense<0xFF800000> : vector<8xf32>
    %116 = vector.multi_reduction <maximumf>, %115, %cst_47 [1] : vector<8x8xf32> to vector<8xf32>
    %117 = vector.shape_cast %116 : vector<8xf32> to vector<8x1xf32>
    %118 = vector.broadcast %117 : vector<8x1xf32> to vector<8x8xf32>
    %119 = arith.subf %115, %118 : vector<8x8xf32>
    %120 = math.exp %119 : vector<8x8xf32>
    %cst_48 = arith.constant dense<0.000000e+00> : vector<8xf32>
    %121 = vector.multi_reduction <add>, %120, %cst_48 [1] : vector<8x8xf32> to vector<8xf32>
    %122 = vector.shape_cast %121 : vector<8xf32> to vector<8x1xf32>
    %cst_49 = arith.constant dense<0.000000e+00> : vector<8x8xf32>
    %123 = tpu.matmul %120, %112, %cst_49 {dimension_numbers = #tpu.dot_dimension_numbers<[1], [0], [0], [1], [0, 0, 1, 1], [], []>} : vector<8x8xf32>, vector<8x8xf32>, vector<8x8xf32> -> vector<8x8xf32>
    %124 = tpu.reciprocal %122 {approx = true} : vector<8x1xf32> -> vector<8x1xf32>
    %125 = vector.broadcast %124 : vector<8x1xf32> to vector<8x8xf32>
    %126 = arith.mulf %123, %125 : vector<8x8xf32>
    %c8_50 = arith.constant 8 : index
    %c0_51 = arith.constant 0 : index
    %127 = vector.load %arg14[%c8_50, %c0_51] : memref<16x32xf32, #tpu.memory_space<vmem>>, vector<8x8xf32>
    tpu.vector_store %arg14[%c8_50, %c0_51], %126 {strides = array<i32>} : memref<16x32xf32, #tpu.memory_space<vmem>>, vector<8x8xf32>,
    %128 = vector.extract_strided_slice %107 {offsets = [0, 8], sizes = [8, 8], strides = [1, 1]} : vector<8x32xf32> to vector<8x8xf32>
    %129 = vector.extract_strided_slice %108 {offsets = [0, 8], sizes = [8, 8], strides = [1, 1]} : vector<8x32xf32> to vector<8x8xf32>
    %130 = vector.extract_strided_slice %109 {offsets = [0, 8], sizes = [8, 8], strides = [1, 1]} : vector<8x32xf32> to vector<8x8xf32>
    %cst_52 = arith.constant dense<0.000000e+00> : vector<8x8xf32>
    %131 = tpu.matmul %128, %129, %cst_52 {dimension_numbers = #tpu.dot_dimension_numbers<[1], [1], [0], [0], [0, 0, 1, 0], [], []>} : vector<8x8xf32>, vector<8x8xf32>, vector<8x8xf32> -> vector<8x8xf32>
    %cst_53 = arith.constant -1.000000e+20 : f32
    %132 = vector.broadcast %cst_53 : f32 to vector<8x8xf32>
    %133 = arith.select %106, %131, %132 : vector<8x8xi1>, vector<8x8xf32>
    %cst_54 = arith.constant dense<0xFF800000> : vector<8xf32>
    %134 = vector.multi_reduction <maximumf>, %133, %cst_54 [1] : vector<8x8xf32> to vector<8xf32>
    %135 = vector.shape_cast %134 : vector<8xf32> to vector<8x1xf32>
    %136 = vector.broadcast %135 : vector<8x1xf32> to vector<8x8xf32>
    %137 = arith.subf %133, %136 : vector<8x8xf32>
    %138 = math.exp %137 : vector<8x8xf32>
    %cst_55 = arith.constant dense<0.000000e+00> : vector<8xf32>
    %139 = vector.multi_reduction <add>, %138, %cst_55 [1] : vector<8x8xf32> to vector<8xf32>
    %140 = vector.shape_cast %139 : vector<8xf32> to vector<8x1xf32>
    %cst_56 = arith.constant dense<0.000000e+00> : vector<8x8xf32>
    %141 = tpu.matmul %138, %130, %cst_56 {dimension_numbers = #tpu.dot_dimension_numbers<[1], [0], [0], [1], [0, 0, 1, 1], [], []>} : vector<8x8xf32>, vector<8x8xf32>, vector<8x8xf32> -> vector<8x8xf32>
    %142 = tpu.reciprocal %140 {approx = true} : vector<8x1xf32> -> vector<8x1xf32>
    %143 = vector.broadcast %142 : vector<8x1xf32> to vector<8x8xf32>
    %144 = arith.mulf %141, %143 : vector<8x8xf32>
    %c8_57 = arith.constant 8 : index
    %c8_58 = arith.constant 8 : index
    %145 = vector.load %arg14[%c8_57, %c8_58] : memref<16x32xf32, #tpu.memory_space<vmem>>, vector<8x8xf32>
    tpu.vector_store %arg14[%c8_57, %c8_58], %144 {strides = array<i32>} : memref<16x32xf32, #tpu.memory_space<vmem>>, vector<8x8xf32>,
    %146 = vector.extract_strided_slice %107 {offsets = [0, 16], sizes = [8, 8], strides = [1, 1]} : vector<8x32xf32> to vector<8x8xf32>
    %147 = vector.extract_strided_slice %108 {offsets = [0, 16], sizes = [8, 8], strides = [1, 1]} : vector<8x32xf32> to vector<8x8xf32>
    %148 = vector.extract_strided_slice %109 {offsets = [0, 16], sizes = [8, 8], strides = [1, 1]} : vector<8x32xf32> to vector<8x8xf32>
    %cst_59 = arith.constant dense<0.000000e+00> : vector<8x8xf32>
    %149 = tpu.matmul %146, %147, %cst_59 {dimension_numbers = #tpu.dot_dimension_numbers<[1], [1], [0], [0], [0, 0, 1, 0], [], []>} : vector<8x8xf32>, vector<8x8xf32>, vector<8x8xf32> -> vector<8x8xf32>
    %cst_60 = arith.constant -1.000000e+20 : f32
    %150 = vector.broadcast %cst_60 : f32 to vector<8x8xf32>
    %151 = arith.select %106, %149, %150 : vector<8x8xi1>, vector<8x8xf32>
    %cst_61 = arith.constant dense<0xFF800000> : vector<8xf32>
    %152 = vector.multi_reduction <maximumf>, %151, %cst_61 [1] : vector<8x8xf32> to vector<8xf32>
    %153 = vector.shape_cast %152 : vector<8xf32> to vector<8x1xf32>
    %154 = vector.broadcast %153 : vector<8x1xf32> to vector<8x8xf32>
    %155 = arith.subf %151, %154 : vector<8x8xf32>
    %156 = math.exp %155 : vector<8x8xf32>
    %cst_62 = arith.constant dense<0.000000e+00> : vector<8xf32>
    %157 = vector.multi_reduction <add>, %156, %cst_62 [1] : vector<8x8xf32> to vector<8xf32>
    %158 = vector.shape_cast %157 : vector<8xf32> to vector<8x1xf32>
    %cst_63 = arith.constant dense<0.000000e+00> : vector<8x8xf32>
    %159 = tpu.matmul %156, %148, %cst_63 {dimension_numbers = #tpu.dot_dimension_numbers<[1], [0], [0], [1], [0, 0, 1, 1], [], []>} : vector<8x8xf32>, vector<8x8xf32>, vector<8x8xf32> -> vector<8x8xf32>
    %160 = tpu.reciprocal %158 {approx = true} : vector<8x1xf32> -> vector<8x1xf32>
    %161 = vector.broadcast %160 : vector<8x1xf32> to vector<8x8xf32>
    %162 = arith.mulf %159, %161 : vector<8x8xf32>
    %c8_64 = arith.constant 8 : index
    %c16_65 = arith.constant 16 : index
    %163 = vector.load %arg14[%c8_64, %c16_65] : memref<16x32xf32, #tpu.memory_space<vmem>>, vector<8x8xf32>
    tpu.vector_store %arg14[%c8_64, %c16_65], %162 {strides = array<i32>} : memref<16x32xf32, #tpu.memory_space<vmem>>, vector<8x8xf32>,
    %164 = vector.extract_strided_slice %107 {offsets = [0, 24], sizes = [8, 8], strides = [1, 1]} : vector<8x32xf32> to vector<8x8xf32>
    %165 = vector.extract_strided_slice %108 {offsets = [0, 24], sizes = [8, 8], strides = [1, 1]} : vector<8x32xf32> to vector<8x8xf32>
    %166 = vector.extract_strided_slice %109 {offsets = [0, 24], sizes = [8, 8], strides = [1, 1]} : vector<8x32xf32> to vector<8x8xf32>
    %cst_66 = arith.constant dense<0.000000e+00> : vector<8x8xf32>
    %167 = tpu.matmul %164, %165, %cst_66 {dimension_numbers = #tpu.dot_dimension_numbers<[1], [1], [0], [0], [0, 0, 1, 0], [], []>} : vector<8x8xf32>, vector<8x8xf32>, vector<8x8xf32> -> vector<8x8xf32>
    %cst_67 = arith.constant -1.000000e+20 : f32
    %168 = vector.broadcast %cst_67 : f32 to vector<8x8xf32>
    %169 = arith.select %106, %167, %168 : vector<8x8xi1>, vector<8x8xf32>
    %cst_68 = arith.constant dense<0xFF800000> : vector<8xf32>
    %170 = vector.multi_reduction <maximumf>, %169, %cst_68 [1] : vector<8x8xf32> to vector<8xf32>
    %171 = vector.shape_cast %170 : vector<8xf32> to vector<8x1xf32>
    %172 = vector.broadcast %171 : vector<8x1xf32> to vector<8x8xf32>
    %173 = arith.subf %169, %172 : vector<8x8xf32>
    %174 = math.exp %173 : vector<8x8xf32>
    %cst_69 = arith.constant dense<0.000000e+00> : vector<8xf32>
    %175 = vector.multi_reduction <add>, %174, %cst_69 [1] : vector<8x8xf32> to vector<8xf32>
    %176 = vector.shape_cast %175 : vector<8xf32> to vector<8x1xf32>
    %cst_70 = arith.constant dense<0.000000e+00> : vector<8x8xf32>
    %177 = tpu.matmul %174, %166, %cst_70 {dimension_numbers = #tpu.dot_dimension_numbers<[1], [0], [0], [1], [0, 0, 1, 1], [], []>} : vector<8x8xf32>, vector<8x8xf32>, vector<8x8xf32> -> vector<8x8xf32>
    %178 = tpu.reciprocal %176 {approx = true} : vector<8x1xf32> -> vector<8x1xf32>
    %179 = vector.broadcast %178 : vector<8x1xf32> to vector<8x8xf32>
    %180 = arith.mulf %177, %179 : vector<8x8xf32>
    %c8_71 = arith.constant 8 : index
    %c24_72 = arith.constant 24 : index
    %181 = vector.load %arg14[%c8_71, %c24_72] : memref<16x32xf32, #tpu.memory_space<vmem>>, vector<8x8xf32>
    tpu.vector_store %arg14[%c8_71, %c24_72], %180 {strides = array<i32>} : memref<16x32xf32, #tpu.memory_space<vmem>>, vector<8x8xf32>,
    %c0_73 = arith.constant 0 : index
    %c0_74 = arith.constant 0 : index
    %182 = vector.load %arg14[%c0_73, %c0_74] : memref<16x32xf32, #tpu.memory_space<vmem>>, vector<16x32xf32>
    %c0_75 = arith.constant 0 : index
    %c0_76 = arith.constant 0 : index
    %183 = vector.load %arg11[%c0_75, %c0_76] : memref<32x32xf32, #tpu.memory_space<vmem>>, vector<32x32xf32>
    %cst_77 = arith.constant dense<0.000000e+00> : vector<16x32xf32>
    %184 = tpu.matmul %182, %183, %cst_77 {dimension_numbers = #tpu.dot_dimension_numbers<[1], [0], [0], [1], [0, 0, 1, 1], [], []>} : vector<16x32xf32>, vector<32x32xf32>, vector<16x32xf32> -> vector<16x32xf32>
    %c0_78 = arith.constant 0 : index
    %c0_79 = arith.constant 0 : index
    %185 = vector.load %arg12[%c0_78, %c0_79] : memref<1x32xf32, #tpu.memory_space<vmem>>, vector<1x32xf32>
    %186 = vector.broadcast %185 : vector<1x32xf32> to vector<16x32xf32>
    %187 = arith.addf %184, %186 : vector<16x32xf32>
    %c0_80 = arith.constant 0 : index
    %c0_81 = arith.constant 0 : index
    %188 = vector.load %arg13[%c0_80, %c0_81] : memref<16x32xf32, #tpu.memory_space<vmem>>, vector<16x32xf32>
    tpu.vector_store %arg13[%c0_80, %c0_81], %187 {strides = array<i32>} : memref<16x32xf32, #tpu.memory_space<vmem>>, vector<16x32xf32>,
    return
  }
  func.func @transform_0(%arg0: i32, %arg1: memref<2xi32, #tpu.memory_space<smem>>) -> (i32, i32) {
    %c0_i32 = arith.constant 0 : i32
    %c0_i32_0 = arith.constant 0 : i32
    return %arg0, %c0_i32 : i32, i32
  }
  func.func @transform_1(%arg0: i32, %arg1: memref<2xi32, #tpu.memory_space<smem>>) -> (i32, i32) {
    %c0_i32 = arith.constant 0 : i32
    %c0_i32_0 = arith.constant 0 : i32
    return %arg0, %c0_i32 : i32, i32
  }
  func.func @transform_2(%arg0: i32, %arg1: memref<2xi32, #tpu.memory_space<smem>>) -> (i32, i32) {
    %c0_i32 = arith.constant 0 : i32
    %c0_i32_0 = arith.constant 0 : i32
    return %arg0, %c0_i32 : i32, i32
  }
  func.func @transform_3(%arg0: i32, %arg1: memref<2xi32, #tpu.memory_space<smem>>) -> (i32, i32) {
    %c0_i32 = arith.constant 0 : i32
    %c0_i32_0 = arith.constant 0 : i32
    %c0_i32_1 = arith.constant 0 : i32
    return %c0_i32, %c0_i32_0 : i32, i32
  }
  func.func @transform_4(%arg0: i32, %arg1: memref<2xi32, #tpu.memory_space<smem>>) -> (i32, i32) {
    %c0_i32 = arith.constant 0 : i32
    %c0_i32_0 = arith.constant 0 : i32
    %c0_i32_1 = arith.constant 0 : i32
    return %c0_i32, %c0_i32_0 : i32, i32
  }
  func.func @transform_5(%arg0: i32, %arg1: memref<2xi32, #tpu.memory_space<smem>>) -> (i32, i32) {
    %c0_i32 = arith.constant 0 : i32
    %c0_i32_0 = arith.constant 0 : i32
    %c0_i32_1 = arith.constant 0 : i32
    return %c0_i32, %c0_i32_0 : i32, i32
  }
  func.func @transform_6(%arg0: i32, %arg1: memref<2xi32, #tpu.memory_space<smem>>) -> (i32, i32) {
    %c0_i32 = arith.constant 0 : i32
    %c0_i32_0 = arith.constant 0 : i32
    %c0_i32_1 = arith.constant 0 : i32
    return %c0_i32, %c0_i32_0 : i32, i32
  }
  func.func @transform_7(%arg0: i32, %arg1: memref<2xi32, #tpu.memory_space<smem>>) -> (i32, i32) {
    %c0_i32 = arith.constant 0 : i32
    %c0_i32_0 = arith.constant 0 : i32
    %c0_i32_1 = arith.constant 0 : i32
    return %c0_i32, %c0_i32_0 : i32, i32
  }
  func.func @transform_8(%arg0: i32, %arg1: memref<2xi32, #tpu.memory_space<smem>>) -> (i32, i32) {
    %c0_i32 = arith.constant 0 : i32
    %c0_i32_0 = arith.constant 0 : i32
    %c0_i32_1 = arith.constant 0 : i32
    return %c0_i32, %c0_i32_0 : i32, i32
  }
  func.func @transform_9(%arg0: i32, %arg1: memref<2xi32, #tpu.memory_space<smem>>) -> (i32, i32) {
    %c0_i32 = arith.constant 0 : i32
    %c0_i32_0 = arith.constant 0 : i32
    %c0_i32_1 = arith.constant 0 : i32
    return %c0_i32, %c0_i32_0 : i32, i32
  }
  func.func @transform_10(%arg0: i32, %arg1: memref<2xi32, #tpu.memory_space<smem>>) -> (i32, i32) {
    %c0_i32 = arith.constant 0 : i32
    %c0_i32_0 = arith.constant 0 : i32
    %c0_i32_1 = arith.constant 0 : i32
    return %c0_i32, %c0_i32_0 : i32, i32
  }
  func.func @transform_11(%arg0: i32, %arg1: memref<2xi32, #tpu.memory_space<smem>>) -> (i32, i32) {
    %c0_i32 = arith.constant 0 : i32
    %c0_i32_0 = arith.constant 0 : i32
    return %arg0, %c0_i32 : i32, i32
  }
}

</mosaic_0001>

<bundles_post_ra>
// kernel: tpu_custom_call.1
= control target key start
LH: loop header
LB: loop body
LE: loop exit
PB: predicated region body
PF: predicated region fallthrough
CT: control target
= control target key end

     0   :  { %s2353_s21 = smov [#allocation4]   ;;  %s2681_s0 = inlined_call_operand.hbm [shape: s32[2], index: 0, kind: input, shape index: {}]   ;;  %s2682_s1 = inlined_call_operand.hbm [shape: f32[16,32], index: 1, kind: input, shape index: {}]   ;;  %s2683_s2 = inlined_call_operand.hbm [shape: f32[16,32], index: 2, kind: input, shape index: {}]   ;;  %s2684_s3 = inlined_call_operand.hbm [shape: f32[16,32], index: 3, kind: input, shape index: {}]   ;;  %s2685_s4 = inlined_call_operand.hbm [shape: f32[32,32], index: 4, kind: input, shape index: {}]   ;;  %s2686_s5 = inlined_call_operand.vmem [shape: f32[1,32], index: 5, kind: input, shape index: {}]   ;;  %s2687_s6 = inlined_call_operand.hbm [shape: f32[32,32], index: 6, kind: input, shape index: {}]   ;;  %s2688_s7 = inlined_call_operand.vmem [shape: f32[1,32], index: 7, kind: input, shape index: {}]   ;;  %s2689_s8 = inlined_call_operand.hbm [shape: f32[32,32], index: 8, kind: input, shape index: {}]   ;;  %s2690_s9 = inlined_call_operand.vmem [shape: f32[1,32], index: 9, kind: input, shape index: {}]   ;;  %s2691_s10 = inlined_call_operand.hbm [shape: f32[32,32], index: 10, kind: input, shape index: {}]   ;;  %s2692_s11 = inlined_call_operand.vmem [shape: f32[1,32], index: 11, kind: input, shape index: {}]   ;;  %s2693_s12 = inlined_call_operand.hbm [shape: f32[16,32], index: 12, kind: output, shape index: {}]  }
   0x1   :  { %18 = dma.hbm_to_smem %s2681_s0, 16, %s2353_s21, [#allocation3] }
   0x2   :  { %2341 = dma.done.wait [#allocation3], 16 }
   0x3   :  { %2342 = vsyncadd [#allocation3], 4294967280 }
   0x4   :  { %20 = sfence }
   0x5   :  { %21 = vsyncpa [#allocation6], 0 }
   0x6   :  { %22 = vsyncpa [#allocation9], 0 }
   0x7   :  { %23 = vsyncpa [#allocation12], 0 }
   0x8   :  { %24 = vsyncpa [#allocation15], 0 }
   0x9   :  { %25 = vsyncpa [#allocation7], 0  ;;  %s2354_s24 = smov [#allocation8]   ;;  %s2355_s26 = smov [#allocation11]  }
   0xa   :  { %s43_s25 = sshll.u32 %s2354_s24, 4  ;;  %s67_s27 = sshll.u32 %s2355_s26, 4  ;;  %s44_s25 = int_to_ptr.vmem [resolvable:$true] %s43_s25  ;;  %s68_s27 = int_to_ptr.vmem [resolvable:$true] %s67_s27 }
   0xb   :  { %s2189_s28 = scalar_lea.vmem %s44_s25, 256  ;;  %p2194_p1 = scmp.lt.s32.totalorder %s44_s25, %s44_s25 }
   0xc   :  { %p2190_p0 = scmp.ne.s32.totalorder %s44_s25, %s2189_s28  ;;  %p2195_p2 = scmp.lt.s32.totalorder %s2189_s28, %s2189_s28 }
   0xe   :  { %p2196_p3 = por %p2195_p2, %p2194_p1 }
  0x10   :  { %p2197_p4 = pnand %p2196_p3, %p2190_p0 }
  0x12   :  { %2200 = shalt.err (!%p2197_p4)
}
  0x13   :  { %s2356_s0 = smov 128   ;;  %s2357_s29 = smov 8  }
  0x14   :  { %49 = dma.hbm_to_vmem [thread:$0]  %s2683_s2, 256, %s44_s25, [#allocation9], %s2356_s0, %s2356_s0, %s2357_s29  }
  0x15   :  { %s2209_s14 = scalar_lea.vmem %s68_s27, 512  ;;  %p2214_p6 = scmp.lt.s32.totalorder %s68_s27, %s68_s27 }
  0x16   :  { %p2210_p5 = scmp.ne.s32.totalorder %s68_s27, %s2209_s14  ;;  %p2215_p7 = scmp.lt.s32.totalorder %s2209_s14, %s2209_s14 }
  0x18   :  { %p2216_p8 = por %p2215_p7, %p2214_p6 }
  0x1a   :  { %p2217_p9 = pnand %p2216_p8, %p2210_p5 }
  0x1c   :  { %2220 = shalt.err (!%p2217_p9)
}
  0x1d   :  { %73 = dma.hbm_to_vmem [thread:$0]  %s2685_s4, 512, %s68_s27, [#allocation12], %s2356_s0, %s2356_s0, %s2357_s29  }
  0x1e   :  { %s2358_s17 = smov [#allocation14]   ;;  %s2359_s19 = smov [#allocation5]  }
  0x1f   :  { %s95_s18 = sshll.u32 %s2358_s17, 4  ;;  %s31_s20 = sshll.u32 %s2359_s19, 4  ;;  %s96_s18 = int_to_ptr.vmem [resolvable:$true] %s95_s18  ;;  %s32_s20 = int_to_ptr.vmem [resolvable:$true] %s31_s20 }
  0x20   :  { %s2229_s2 = scalar_lea.vmem %s96_s18, 512  ;;  %p2234_p11 = scmp.lt.s32.totalorder %s96_s18, %s96_s18 }
  0x21   :  { %p2230_p10 = scmp.ne.s32.totalorder %s96_s18, %s2229_s2  ;;  %p2235_p12 = scmp.lt.s32.totalorder %s2229_s2, %s2229_s2 }
  0x23   :  { %p2236_p13 = por %p2235_p12, %p2234_p11 }
  0x25   :  { %p2237_p0 = pnand %p2236_p13, %p2230_p10 }
  0x27   :  { %2240 = shalt.err (!%p2237_p0)
}
  0x28   :  { %101 = dma.hbm_to_vmem [thread:$0]  %s2689_s8, 512, %s96_s18, [#allocation15], %s2356_s0, %s2356_s0, %s2357_s29  }
  0x29   :  { %s2249_s4 = scalar_lea.vmem %s32_s20, 256  ;;  %p2254_p2 = scmp.lt.s32.totalorder %s32_s20, %s32_s20 }
  0x2a   :  { %p2250_p1 = scmp.ne.s32.totalorder %s32_s20, %s2249_s4  ;;  %p2255_p3 = scmp.lt.s32.totalorder %s2249_s4, %s2249_s4 }
  0x2c   :  { %p2256_p4 = por %p2255_p3, %p2254_p2 }
  0x2e   :  { %p2257_p5 = pnand %p2256_p4, %p2250_p1 }
  0x30   :  { %2260 = shalt.err (!%p2257_p5)
}
  0x31   :  { %37 = dma.hbm_to_vmem [thread:$0]  %s2682_s1, 256, %s32_s20, [#allocation6], %s2356_s0, %s2356_s0, %s2357_s29  }
  0x32   :  { %s2360_s25 = smov [#allocation10]   ;;  %s2361_s27 = smov [#allocation13]  }
  0x33   :  { %s55_s26 = sshll.u32 %s2360_s25, 4  ;;  %s81_s28 = sshll.u32 %s2361_s27, 4  ;;  %s56_s26 = int_to_ptr.vmem [resolvable:$true] %s55_s26  ;;  %s82_s28 = int_to_ptr.vmem [resolvable:$true] %s81_s28 }
  0x34   :  { %s2269_s8 = scalar_lea.vmem %s56_s26, 256  ;;  %p2274_p7 = scmp.lt.s32.totalorder %s56_s26, %s56_s26 }
  0x35   :  { %p2270_p6 = scmp.ne.s32.totalorder %s56_s26, %s2269_s8  ;;  %p2275_p8 = scmp.lt.s32.totalorder %s2269_s8, %s2269_s8 }
  0x37   :  { %p2276_p9 = por %p2275_p8, %p2274_p7 }
  0x39   :  { %p2277_p10 = pnand %p2276_p9, %p2270_p6 }
  0x3b   :  { %2280 = shalt.err (!%p2277_p10)
}
  0x3c   :  { %61 = dma.hbm_to_vmem [thread:$0]  %s2684_s3, 256, %s56_s26, [#allocation9], %s2356_s0, %s2356_s0, %s2357_s29  }
  0x3d   :  { %s2289_s1 = scalar_lea.vmem %s82_s28, 512  ;;  %p2294_p12 = scmp.lt.s32.totalorder %s82_s28, %s82_s28 }
  0x3e   :  { %p2290_p11 = scmp.ne.s32.totalorder %s82_s28, %s2289_s1  ;;  %p2295_p13 = scmp.lt.s32.totalorder %s2289_s1, %s2289_s1 }
  0x40   :  { %p2296_p0 = por %p2295_p13, %p2294_p12 }
  0x42   :  { %p2297_p1 = pnand %p2296_p0, %p2290_p11 }
  0x44   :  { %2300 = shalt.err (!%p2297_p1)
}
  0x45   :  { %87 = dma.hbm_to_vmem [thread:$0]  %s2687_s6, 512, %s82_s28, [#allocation12], %s2356_s0, %s2356_s0, %s2357_s29  }
  0x46   :  { %s2362_s16 = smov [#allocation16]  }
  0x47   :  { %s109_s17 = sshll.u32 %s2362_s16, 4  ;;  %s110_s17 = int_to_ptr.vmem [resolvable:$true] %s109_s17 }
  0x48   :  { %s2309_s18 = scalar_lea.vmem %s110_s17, 512  ;;  %p2314_p3 = scmp.lt.s32.totalorder %s110_s17, %s110_s17 }
  0x49   :  { %p2310_p2 = scmp.ne.s32.totalorder %s110_s17, %s2309_s18  ;;  %p2315_p4 = scmp.lt.s32.totalorder %s2309_s18, %s2309_s18 }
  0x4b   :  { %p2316_p5 = por %p2315_p4, %p2314_p3 }
  0x4d   :  { %p2317_p6 = pnand %p2316_p5, %p2310_p2 }
  0x4f   :  { %2320 = shalt.err (!%p2317_p6)
}
  0x50   :  { %115 = dma.hbm_to_vmem [thread:$0]  %s2691_s10, 512, %s110_s17, [#allocation15], %s2356_s0, %s2356_s0, %s2357_s29  }
  0x51   :  { %2343 = dma.done.wait [#allocation6], 256  }
  0x52   :  { %2344 = vsyncadd [#allocation6], 4294967040 }
  0x53   :  { %2345 = dma.done.wait [#allocation9], 512  }
  0x54   :  { %2346 = vsyncadd [#allocation9], 4294966784 }
  0x55   :  { %2347 = dma.done.wait [#allocation12], 1024  }
  0x56   :  { %2348 = vsyncadd [#allocation12], 4294966272 }
  0x57   :  { %2349 = dma.done.wait [#allocation15], 1024  }
  0x58   :  { %2350 = vsyncadd [#allocation15], 4294966272  ;;  %v144_v0 = vld [vmem:[#allocation11 + $0x18] sm:$0xff]  ;;  %v143_v2 = vld [vmem:[#allocation11 + $0x10] sm:$0xff]  ;;  %vm152_vm0 = vcmask 261120   ;;  %v2363_v12 = vmov 0.0   ;;  %v425_v39 = vlaneseq }
  0x59   :  { %v239_v1 = vld [vmem:[#allocation13 + $0x18] sm:$0xff]  ;;  %1999 = vmatprep.subr.mxu0 %v144_v0  ;;  %v238_v3 = vld [vmem:[#allocation13 + $0x10] sm:$0xff]  ;;  %v142_v4 = vld [vmem:[#allocation11 + $0x8] sm:$0xff]  ;;  %vm2364_vm1 = vmmov 0   ;;  %vm430_vm2 = vcmask 64512   ;;  %s2365_s21 = smov 120  }
  0x5a   :  { %2010 = vmatprep.subr.mxu1 %v239_v1  ;;  %2000 = vmatpush3.msra.mxu0 %v144_v0  ;;  %v237_v5 = vld [vmem:[#allocation13 + $0x8] sm:$0xff]  ;;  %v141_v6 = vld [vmem:[#allocation11] sm:$0xff]  ;;  %v139_v8 = vld [vmem:[#allocation5] sm:$0xff]  ;;  %s427_s22 = sld [smem:[#allocation4]]  ;;  %v426_v44 = vand.u32 127, %v425_v39  ;;  %s2368_s24 = smov 16  }
  0x5b   :  { %2011 = vmatpush3.msra.mxu1 %v239_v1  ;;  %2001 = vmatprep.subr.mxu0 %v143_v2  ;;  %v236_v7 = vld [vmem:[#allocation13] sm:$0xff]  ;;  %v140_v10 = vld [vmem:[#allocation5 + $0x8] sm:$0xff]  ;;  %v235_v11 = vld [vmem:[#allocation8 + $0x8] sm:$0xff]  ;;  %s2369_s25 = smov 24   ;;  %vm764_vm5 = vcmask 130112   ;;  %vm936_vm6 = vcmask 195712  }
  0x5c   :  { %2012 = vmatprep.subr.mxu1 %v238_v3  ;;  %2002 = vmatpush3.msra.mxu0 %v143_v2  ;;  %v234_v9 = vld [vmem:[#allocation8] sm:$0xff]  ;;  %v333_v13 = vld [vmem:[#allocation14 + $0x18] sm:$0xff]  ;;  %v332_v14 = vld [vmem:[#allocation14 + $0x10] sm:$0xff]  ;;  %vm1108_vm7 = vcmask 261312   ;;  %s2370_s28 = smov [#allocation17]  }
  0x5d   :  { %2013 = vmatpush3.msra.mxu1 %v238_v3  ;;  %2003 = vmatprep.subr.mxu0 %v142_v4  ;;  %v331_v15 = vld [vmem:[#allocation14 + $0x8] sm:$0xff]  ;;  %v330_v16 = vld [vmem:[#allocation14] sm:$0xff]  ;;  %v328_v17 = vld [vmem:[#allocation10] sm:$0xff]  ;;  %s1891_s8 = sshll.u32 %s2370_s28, 4  ;;  %s1892_s8 = int_to_ptr.vmem [resolvable:$true] %s1891_s8 }
  0x5e   :  { %2014 = vmatprep.subr.mxu1 %v237_v5  ;;  %2004 = vmatpush3.msra.mxu0 %v142_v4  ;;  %v329_v18 = vld [vmem:[#allocation10 + $0x8] sm:$0xff]  ;;  %v1906_v20 = vld [vmem:[%s2686_s5] ss:$0 sm:$0xff]  ;;  %s2366_s5 = smov 112   ;;  %s2321_s30 = scalar_lea.vmem %s1892_s8, 256 }
  0x5f   :  { %2015 = vmatpush3.msra.mxu1 %v237_v5  ;;  %2005 = vmatprep.subr.mxu0 %v141_v6  ;;  %v1909_v22 = vld [vmem:[%s2688_s7] ss:$0 sm:$0xff]  ;;  %s2367_s7 = smov 104   ;;  %p2322_p7 = scmp.ne.s32.totalorder %s1892_s8, %s2321_s30 }
  0x60   :  { %2016 = vmatprep.subr.mxu1 %v236_v7  ;;  %2006 = vmatpush3.msra.mxu0 %v141_v6  ;;  %v1912_v38 = vld [vmem:[%s2690_s9] ss:$0 sm:$0xff]  ;;  %v428_v45 = vstv %s427_s22  ;;  %s1927_s9 = sld [smem:[#allocation4 + $0x1]]  ;;  %p2326_p8 = scmp.lt.s32.totalorder %s1892_s8, %s1892_s8 }
  0x61   :  { %2007 = vmatprep.mubr.msk.f32.mxu0 %vm152_vm0, %v139_v8  ;;  %2017 = vmatpush3.msra.mxu1 %v236_v7  ;;  %vm2544_vm3 = vcmp.lt.s32.totalorder %v426_v44, %v428_v45  ;;  %p2327_p9 = scmp.lt.s32.totalorder %s2321_s30, %s2321_s30 }
  0x62   :  { %2018 = vmatprep.mubr.msk.f32.mxu1 %vm152_vm0, %v234_v9  ;;  %2008 = vmatmul.mubr.msk.f32.vlgmr.msra.gmra.mxu0 %vm152_vm0, %v140_v10 }
  0x63   :  { %2019 = vmatmul.mubr.msk.f32.vlgmr.msra.gmra.mxu1 %vm152_vm0, %v235_v11  ;;  %2032 = vmatprep.subr.mxu1 %v2363_v12  ;;  %p2328_p10 = por %p2327_p9, %p2326_p8 }
  0x64   :  { %2034 = vmatprep.mubr.msk.f32.mxu1 %vm2364_vm1, %v2363_v12  ;;  %2021 = vmatprep.subr.mxu0 %v333_v13 }
  0x65   :  { %2022 = vmatpush3.msra.mxu0 %v333_v13  ;;  %2029 = vmatprep.mubr.msk.f32.mxu0 %vm152_vm0, %v328_v17  ;;  %p2329_p11 = pnand %p2328_p10, %p2322_p7 }
  0x66   :  { %2023 = vmatprep.subr.mxu0 %v332_v14  ;;  %v1112_v55 = vstv %s1927_s9 }
  0x67   :  { %2024 = vmatpush3.msra.mxu0 %v332_v14  ;;  %vm2566_vm4 = vcmp.lt.s32.totalorder %v426_v44, %v1112_v55 }
  0x68   :  { %2025 = vmatprep.subr.mxu0 %v331_v15 }
  0x69   :  { %2026 = vmatpush3.msra.mxu0 %v331_v15 }
  0x6a   :  { %2027 = vmatprep.subr.mxu0 %v330_v16 }
  0x6b   :  { %2028 = vmatpush3.msra.mxu0 %v330_v16 }
  0x6c   :  { %2052 = vmatprep.subr.mxu0 %v2363_v12  ;;  %2030 = vmatmul.mubr.msk.f32.vlgmr.msra.gmra.mxu0 %vm152_vm0, %v329_v18 }
  0x6d   :  { %2054 = vmatprep.mubr.msk.f32.mxu0 %vm2364_vm1, %v2363_v12 }
 0x122   :  { %v2009_v19 = vpop.f32.mrf.mxu0 }
 0x123   :  { %v2020_v21 = vpop.f32.mrf.mxu1  ;;  %v231_v28 = vadd.f32 %v2009_v19, %v1906_v20 }
 0x124   :  { %v225_v23 = vpop.f32.mrf.mxu0  ;;  %v325_v29 = vadd.f32 %v2020_v21, %v1909_v22 }
 0x125   :  { %v319_v24 = vpop.f32.mrf.mxu1  ;;  %v226_v25 = vadd.f32 %v1906_v20, %v225_v23  ;;  %v423_v30 = vmul.f32 0.5, %v231_v28 }
 0x126   :  { %v320_v26 = vadd.f32 %v1909_v22, %v319_v24 }
 0x127   :  { %v422_v27 = vmul.f32 0.5, %v226_v25 }
 0x128   :  { %2033 = vmatpush3.xpose.msk.msra.mxu1 %vm430_vm2, %v320_v26 }
 0x129   :  { %2037 = vmatprep.subr.mxu1 %v2363_v12  ;;  %593 = vrot.lane.b32.xlu1 %v422_v27, %s2365_s21 }
 0x12b   :  { %2035 = vmatmul.mubr.msk.f32.vlgmr.msra.gmra.mxu1 %vm430_vm2, %v422_v27 }
 0x12c   :  { %2039 = vmatprep.mubr.msk.f32.mxu1 %vm2364_vm1, %v2363_v12  ;;  %v2031_v40 = vpop.f32.mrf.mxu0 }
 0x12d   :  { %768 = vrot.lane.b32.xlu1 %v320_v26, %s2366_s5  ;;  %v2538_v41 = vadd.f32 %v2031_v40, %v1912_v38 }
 0x12e   :  { %v413_v42 = vpop.f32.mrf.mxu0 }
 0x12f   :  { %v2540_v43 = vadd.f32 %v1912_v38, %v413_v42 }
 0x131   :  { %766 = vrot.lane.b32.xlu1 %v422_v27, %s2366_s5  ;;  %2038 = vmatpush3.msra.mxu1 %v2540_v43 }
 0x132   :  { %2042 = vmatprep.subr.mxu1 %v2363_v12 }
 0x135   :  { %940 = vrot.lane.b32.xlu1 %v320_v26, %s2367_s7 }
 0x139   :  { %938 = vrot.lane.b32.xlu1 %v422_v27, %s2367_s7 }
 0x13d   :  { %1278 = vrot.lane.b32.xlu1 %v325_v29, %s2365_s21 }
 0x141   :  { %1276 = vrot.lane.b32.xlu1 %v423_v30, %s2365_s21 }
 0x145   :  { %1448 = vrot.lane.b32.xlu1 %v423_v30, %s2366_s5 }
 0x149   :  { %1619 = vrot.lane.b32.xlu1 %v423_v30, %s2367_s7 }
 0x19b   :  { %v2513_v31 = vpop.permute.xlu1 %593 }
 0x19f   :  { %v769_v32 = vpop.permute.xlu1 %768 }
 0x1a0   :  { %2053 = vmatpush3.xpose.msk.msra.mxu0 %vm430_vm2, %v769_v32 }
 0x1a1   :  { %2062 = vmatprep.subr.mxu0 %v2363_v12 }
 0x1a3   :  { %v767_v33 = vpop.permute.xlu1 %766 }
 0x1a4   :  { %2055 = vmatmul.mubr.msk.f32.vlgmr.msra.gmra.mxu0 %vm430_vm2, %v767_v33 }
 0x1a5   :  { %2064 = vmatprep.mubr.msk.f32.mxu0 %vm2364_vm1, %v2363_v12 }
 0x1a7   :  { %v941_v34 = vpop.permute.xlu1 %940 }
 0x1a8   :  { %2063 = vmatpush3.xpose.msk.msra.mxu0 %vm430_vm2, %v941_v34 }
 0x1a9   :  { %2072 = vmatprep.subr.mxu0 %v2363_v12 }
 0x1ab   :  { %v939_v35 = vpop.permute.xlu1 %938 }
 0x1ac   :  { %2065 = vmatmul.mubr.msk.f32.vlgmr.msra.gmra.mxu0 %vm430_vm2, %v939_v35 }
 0x1ad   :  { %2073 = vmatpush3.xpose.msk.msra.mxu0 %vm430_vm2, %v325_v29  ;;  %2074 = vmatprep.mubr.msk.f32.mxu0 %vm2364_vm1, %v2363_v12 }
 0x1ae   :  { %2082 = vmatprep.subr.mxu0 %v2363_v12 }
 0x1af   :  { %v1279_v36 = vpop.permute.xlu1 %1278 }
 0x1b0   :  { %2075 = vmatmul.mubr.msk.f32.vlgmr.msra.gmra.mxu0 %vm430_vm2, %v423_v30 }
 0x1b1   :  { %2083 = vmatpush3.xpose.msk.msra.mxu0 %vm430_vm2, %v1279_v36  ;;  %2084 = vmatprep.mubr.msk.f32.mxu0 %vm2364_vm1, %v2363_v12 }
 0x1b2   :  { %2092 = vmatprep.subr.mxu0 %v2363_v12 }
 0x1b3   :  { %v1277_v37 = vpop.permute.xlu1 %1276 }
 0x1b4   :  { %2085 = vmatmul.mubr.msk.f32.vlgmr.msra.gmra.mxu0 %vm430_vm2, %v1277_v37 }
 0x1b5   :  { %2094 = vmatprep.mubr.msk.f32.mxu0 %vm2364_vm1, %v2363_v12 }
 0x1b7   :  { %v1449_v10 = vpop.permute.xlu1 %1448 }
 0x1bb   :  { %v1620_v13 = vpop.permute.xlu1 %1619 }
 0x1eb   :  { %v503_v47 = vpop.f32.mrf.mxu1 }
 0x1ec   :  { %v507_v48 = vsel %vm2544_vm3, %v503_v47, -1e+20 }
 0x1ed   :  { %v2036_v49 = vpop.f32.mrf.mxu1  ;;  %v508_v50 = vsel %vm430_vm2, %v507_v48, -inf }
 0x1ee   :  { %509 = vmax.xlane.f32.xlu0 %v508_v50 }
 0x204   :  { %595 = vrot.lane.b32.xlu0 %v320_v26, %s2365_s21 }
 0x208   :  { %1450 = vrot.lane.b32.xlu0 %v325_v29, %s2366_s5 }
 0x20c   :  { %1621 = vrot.lane.b32.xlu0 %v325_v29, %s2367_s7 }
 0x264   :  { %v840_v51 = vpop.f32.mrf.mxu0 }
 0x265   :  { %v2556_v52 = vsel %vm2544_vm3, %v840_v51, -1e+20 }
 0x266   :  { %v2056_v53 = vpop.f32.mrf.mxu0  ;;  %v845_v54 = vsel %vm430_vm2, %v2556_v52, -inf }
 0x267   :  { %846 = vmax.xlane.f32.xlu1 %v845_v54 }
 0x26c   :  { %v1012_v56 = vpop.f32.mrf.mxu0 }
 0x26d   :  { %v2562_v57 = vsel %vm2544_vm3, %v1012_v56, -1e+20 }
 0x26e   :  { %v2066_v58 = vpop.f32.mrf.mxu0  ;;  %v1017_v59 = vsel %vm430_vm2, %v2562_v57, -inf }
 0x26f   :  { %1018 = vmax.xlane.f32.xlu0 %v1017_v59 }
 0x270   :  { %v1186_v61 = vpop.f32.mrf.mxu0 }
 0x271   :  { %v2572_v62 = vsel %vm2566_vm4, %v1186_v61, -1e+20 }
 0x272   :  { %v2076_v63 = vpop.f32.mrf.mxu0  ;;  %v1191_v0 = vsel %vm430_vm2, %v2572_v62, -inf }
 0x273   :  { %1192 = vmax.xlane.f32.xlu0 %v1191_v0 }
 0x274   :  { %v1350_v1 = vpop.f32.mrf.mxu0 }
 0x275   :  { %v1354_v2 = vsel %vm2566_vm4, %v1350_v1, -1e+20 }
 0x276   :  { %v2086_v3 = vpop.f32.mrf.mxu0  ;;  %v1355_v5 = vsel %vm430_vm2, %v1354_v2, -inf }
 0x277   :  { %v510_v4 = vpop.xlane.xlu0 %509  ;;  %1356 = vmax.xlane.f32.xlu1 %v1355_v5 }
 0x278   :  { %v511_v6 = vsub.f32 %v507_v48, %v510_v4 }
 0x27a   :  { %v512_v7 = vmul.f32 1.442695, %v511_v6 }
 0x27b   :  { %v596_v8 = vpop.permute.xlu0 %595 }
 0x27c   :  { %2141 = vpow2.f32 %v512_v7 }
 0x27f   :  { %v1451_v9 = vpop.permute.xlu0 %1450 }
 0x280   :  { %2093 = vmatpush3.xpose.msk.msra.mxu0 %vm430_vm2, %v1451_v9 }
 0x281   :  { %2102 = vmatprep.subr.mxu0 %v2363_v12 }
 0x283   :  { %2095 = vmatmul.mubr.msk.f32.vlgmr.msra.gmra.mxu0 %vm430_vm2, %v1449_v10  ;;  %v1622_v11 = vpop.permute.xlu0 %1621 }
 0x284   :  { %2103 = vmatpush3.xpose.msk.msra.mxu0 %vm430_vm2, %v1622_v11  ;;  %2104 = vmatprep.mubr.msk.f32.mxu0 %vm2364_vm1, %v2363_v12 }
 0x287   :  { %2105 = vmatmul.mubr.msk.f32.vlgmr.msra.gmra.mxu0 %vm430_vm2, %v1620_v13 }
 0x289   :  { %v2586_v14 = vpop.eup %2141 }
 0x28a   :  { %2040 = vmatmul.mubr.msk.f32.vlgmr.msra.gmra.mxu1 %vm430_vm2, %v2586_v14  ;;  %v514_v60 = vsel %vm430_vm2, %v2586_v14, 0.0 }
 0x28b   :  { %2043 = vmatpush3.xpose.msk.msra.mxu1 %vm430_vm2, %v596_v8  ;;  %2044 = vmatprep.mubr.msk.f32.mxu1 %vm2364_vm1, %v2363_v12 }
 0x28c   :  { %2047 = vmatprep.subr.mxu1 %v2363_v12 }
 0x28e   :  { %2045 = vmatmul.mubr.msk.f32.vlgmr.msra.gmra.mxu1 %vm430_vm2, %v2513_v31 }
 0x28f   :  { %2049 = vmatprep.mubr.msk.f32.mxu1 %vm2364_vm1, %v2363_v12 }
 0x2f0   :  { %v847_v31 = vpop.xlane.xlu1 %846 }
 0x2f1   :  { %v848_v33 = vsub.f32 %v2556_v52, %v847_v31 }
 0x2f3   :  { %v849_v35 = vmul.f32 1.442695, %v848_v33  ;;  %v1795_v33 = vld [vmem:[#allocation16 + $0x18] sm:$0xff] }
 0x2f4   :  { %2112 = vmatprep.subr.mxu0 %v1795_v33 }
 0x2f5   :  { %2113 = vmatpush3.msra.mxu0 %v1795_v33 }
 0x2f8   :  { %v1019_v29 = vpop.xlane.xlu0 %1018 }
 0x2f9   :  { %v1020_v30 = vsub.f32 %v2562_v57, %v1019_v29 }
 0x2fb   :  { %v1021_v32 = vmul.f32 1.442695, %v1020_v30 }
 0x2fc   :  { %v1193_v45 = vpop.xlane.xlu0 %1192 }
 0x2fd   :  { %2143 = vpow2.f32 %v1021_v32  ;;  %v1194_v53 = vsub.f32 %v2572_v62, %v1193_v45 }
 0x2fe   :  { %2145 = vpow2.f32 %v849_v35 }
 0x2ff   :  { %v1195_v58 = vmul.f32 1.442695, %v1194_v53 }
 0x300   :  { %v1357_v34 = vpop.xlane.xlu1 %1356 }
 0x301   :  { %v1358_v36 = vsub.f32 %v1354_v2, %v1357_v34  ;;  %v1794_v34 = vld [vmem:[#allocation16 + $0x10] sm:$0xff] }
 0x302   :  { %2114 = vmatprep.subr.mxu0 %v1794_v34 }
 0x303   :  { %v1359_v37 = vmul.f32 1.442695, %v1358_v36  ;;  %2115 = vmatpush3.msra.mxu0 %v1794_v34 }
 0x305   :  { %2147 = vpow2.f32 %v1359_v37  ;;  %v1793_v37 = vld [vmem:[#allocation16 + $0x8] sm:$0xff] }
 0x306   :  { %2116 = vmatprep.subr.mxu0 %v1793_v37 }
 0x307   :  { %2117 = vmatpush3.msra.mxu0 %v1793_v37 }
 0x30a   :  { %v2144_v38 = vpop.eup %2143 }
 0x30b   :  { %v1023_v39 = vsel %vm430_vm2, %v2144_v38, 0.0  ;;  %v2146_v40 = vpop.eup %2145 }
 0x30c   :  { %v851_v42 = vsel %vm430_vm2, %v2146_v40, 0.0 }
 0x343   :  { %v1522_v15 = vpop.f32.mrf.mxu0 }
 0x344   :  { %v1526_v16 = vsel %vm2566_vm4, %v1522_v15, -1e+20 }
 0x345   :  { %v2096_v17 = vpop.f32.mrf.mxu0  ;;  %v1527_v18 = vsel %vm430_vm2, %v1526_v16, -inf }
 0x346   :  { %1528 = vmax.xlane.f32.xlu0 %v1527_v18 }
 0x347   :  { %v1693_v19 = vpop.f32.mrf.mxu0 }
 0x348   :  { %v1697_v20 = vsel %vm2566_vm4, %v1693_v19, -1e+20 }
 0x349   :  { %v2106_v21 = vpop.f32.mrf.mxu0  ;;  %v1698_v22 = vsel %vm430_vm2, %v1697_v20, -inf }
 0x34a   :  { %1699 = vmax.xlane.f32.xlu1 %v1698_v22  ;;  %v2604_v23 = vpop.f32.mrf.mxu1 }
 0x34c   :  { %v2041_v24 = vpop.f32.mrf.mxu1 }
 0x34e   :  { %v667_v25 = vpop.f32.mrf.mxu1 }
 0x34f   :  { %v671_v26 = vsel %vm2544_vm3, %v667_v25, -1e+20 }
 0x350   :  { %v2046_v27 = vpop.f32.mrf.mxu1  ;;  %v672_v28 = vsel %vm430_vm2, %v671_v26, -inf }
 0x351   :  { %673 = vmax.xlane.f32.xlu0 %v672_v28 }
 0x35b   :  { %854 = vrot.lane.b32.xlu1 %v2540_v43, %s2366_s5 }
 0x35f   :  { %1026 = vrot.lane.b32.xlu1 %v2540_v43, %s2367_s7 }
 0x363   :  { %1536 = vrot.lane.b32.xlu1 %v2538_v41, %s2366_s5 }
 0x367   :  { %682 = vrot.lane.b32.xlu0 %v2540_v43, %s2365_s21  ;;  %v2148_v43 = vpop.eup %2147 }
 0x368   :  { %v1361_v44 = vsel %vm430_vm2, %v2148_v43, 0.0 }
 0x36b   :  { %1365 = vrot.lane.b32.xlu0 %v2538_v41, %s2365_s21 }
 0x36f   :  { %1707 = vrot.lane.b32.xlu0 %v2538_v41, %s2367_s7 }
 0x387   :  { %1024 = vadd.xlane.f32.xlu1 %v1023_v39 }
 0x38e   :  { %852 = vadd.xlane.f32.xlu0 %v851_v42 }
 0x392   :  { %1362 = vadd.xlane.f32.xlu0 %v1361_v44 }
 0x3cf   :  { %v1529_v46 = vpop.xlane.xlu0 %1528 }
 0x3d0   :  { %v1530_v47 = vsub.f32 %v1526_v16, %v1529_v46 }
 0x3d2   :  { %v1531_v48 = vmul.f32 1.442695, %v1530_v47 }
 0x3d3   :  { %v1700_v49 = vpop.xlane.xlu1 %1699 }
 0x3d4   :  { %2149 = vpow2.f32 %v1531_v48  ;;  %v1701_v50 = vsub.f32 %v1697_v20, %v1700_v49 }
 0x3d6   :  { %v1702_v54 = vmul.f32 1.442695, %v1701_v50 }
 0x3d7   :  { %v855_v61 = vpop.permute.xlu1 %854 }
 0x3da   :  { %v674_v51 = vpop.xlane.xlu0 %673 }
 0x3db   :  { %v675_v52 = vsub.f32 %v671_v26, %v674_v51  ;;  %v1027_v1 = vpop.permute.xlu1 %1026 }
 0x3dd   :  { %v676_v55 = vmul.f32 1.442695, %v675_v52 }
 0x3de   :  { %v683_v56 = vpop.permute.xlu0 %682 }
 0x3df   :  { %2151 = vpow2.f32 %v676_v55  ;;  %2048 = vmatpush3.msra.mxu1 %v683_v56  ;;  %v1537_v6 = vpop.permute.xlu1 %1536 }
 0x3e0   :  { %2057 = vmatprep.subr.mxu1 %v2363_v12  ;;  %2153 = vpow2.f32 %v1702_v54 }
 0x3e1   :  { %v2150_v57 = vpop.eup %2149  ;;  %2155 = vpow2.f32 %v1195_v58  ;;  %v1940_v58 = vld [vmem:[%s2692_s11] ss:$0 sm:$0xff] }
 0x3e2   :  { %v1533_v59 = vsel %vm430_vm2, %v2150_v57, 0.0  ;;  %v1366_v5 = vpop.permute.xlu0 %1365 }
 0x3e3   :  { %1534 = vadd.xlane.f32.xlu0 %v1533_v59 }
 0x3e7   :  { %515 = vadd.xlane.f32.xlu0 %v514_v60 }
 0x3ec   :  { %v2152_v62 = vpop.eup %2151 }
 0x3ed   :  { %2050 = vmatmul.mubr.msk.f32.vlgmr.msra.gmra.mxu1 %vm430_vm2, %v2152_v62  ;;  %v678_v63 = vsel %vm430_vm2, %v2152_v62, 0.0  ;;  %v2154_v0 = vpop.eup %2153 }
 0x3ee   :  { %2058 = vmatpush3.msra.mxu1 %v855_v61  ;;  %679 = vadd.xlane.f32.xlu1 %v678_v63  ;;  %v1704_v2 = vsel %vm430_vm2, %v2154_v0, 0.0  ;;  %v2156_v3 = vpop.eup %2155 }
 0x3ef   :  { %2059 = vmatprep.mubr.msk.f32.mxu1 %vm2364_vm1, %v2363_v12  ;;  %2067 = vmatprep.subr.mxu1 %v2363_v12  ;;  %v1197_v4 = vsel %vm430_vm2, %v2156_v3, 0.0 }
 0x3f1   :  { %2060 = vmatmul.mubr.msk.f32.vlgmr.msra.gmra.mxu1 %vm430_vm2, %v2146_v40  ;;  %v1792_v40 = vld [vmem:[#allocation16] sm:$0xff] }
 0x3f2   :  { %2068 = vmatpush3.msra.mxu1 %v1027_v1  ;;  %1705 = vadd.xlane.f32.xlu1 %v1704_v2 }
 0x3f3   :  { %2069 = vmatprep.mubr.msk.f32.mxu1 %vm2364_vm1, %v2363_v12  ;;  %2077 = vmatprep.subr.mxu1 %v2363_v12 }
 0x3f4   :  { %2118 = vmatprep.subr.mxu0 %v1792_v40 }
 0x3f5   :  { %2070 = vmatmul.mubr.msk.f32.vlgmr.msra.gmra.mxu1 %vm430_vm2, %v2144_v38  ;;  %2119 = vmatpush3.msra.mxu0 %v1792_v40 }
 0x3f6   :  { %2078 = vmatpush3.msra.mxu1 %v2538_v41  ;;  %1198 = vadd.xlane.f32.xlu1 %v1197_v4  ;;  %v1708_v41 = vpop.permute.xlu0 %1707 }
 0x3f7   :  { %2079 = vmatprep.mubr.msk.f32.mxu1 %vm2364_vm1, %v2363_v12  ;;  %2087 = vmatprep.subr.mxu1 %v2363_v12 }
 0x3f9   :  { %2080 = vmatmul.mubr.msk.f32.vlgmr.msra.gmra.mxu1 %vm430_vm2, %v2156_v3 }
 0x3fa   :  { %2088 = vmatpush3.msra.mxu1 %v1366_v5  ;;  %2089 = vmatprep.mubr.msk.f32.mxu1 %vm2364_vm1, %v2363_v12 }
 0x3fb   :  { %2097 = vmatprep.subr.mxu1 %v2363_v12 }
 0x3fd   :  { %2090 = vmatmul.mubr.msk.f32.vlgmr.msra.gmra.mxu1 %vm430_vm2, %v2148_v43 }
 0x3fe   :  { %2098 = vmatpush3.msra.mxu1 %v1537_v6  ;;  %2099 = vmatprep.mubr.msk.f32.mxu1 %vm2364_vm1, %v2363_v12 }
 0x3ff   :  { %2107 = vmatprep.subr.mxu1 %v2363_v12 }
 0x401   :  { %2100 = vmatmul.mubr.msk.f32.vlgmr.msra.gmra.mxu1 %vm430_vm2, %v2150_v57 }
 0x402   :  { %2108 = vmatpush3.msra.mxu1 %v1708_v41  ;;  %2109 = vmatprep.mubr.msk.f32.mxu1 %vm2364_vm1, %v2363_v12 }
 0x405   :  { %2110 = vmatmul.mubr.msk.f32.vlgmr.msra.gmra.mxu1 %vm430_vm2, %v2154_v0 }
 0x410   :  { %v1025_v14 = vpop.xlane.xlu1 %1024 }
 0x417   :  { %v853_v7 = vpop.xlane.xlu0 %852 }
 0x41b   :  { %v1363_v8 = vpop.xlane.xlu0 %1362 }
 0x46c   :  { %v1535_v9 = vpop.xlane.xlu0 %1534 }
 0x470   :  { %v516_v10 = vpop.xlane.xlu0 %515 }
 0x471   :  { %2157 = vrcp.f32 %v516_v10 }
 0x477   :  { %v680_v15 = vpop.xlane.xlu1 %679 }
 0x478   :  { %2159 = vrcp.f32 %v680_v15 }
 0x479   :  { %2161 = vrcp.f32 %v853_v7 }
 0x47a   :  { %2163 = vrcp.f32 %v1025_v14 }
 0x47b   :  { %v1706_v16 = vpop.xlane.xlu1 %1705 }
 0x47e   :  { %v2158_v11 = vpop.eup %2157 }
 0x47f   :  { %v591_v13 = vmul.f32 %v2158_v11, %v2604_v23  ;;  %v1199_v17 = vpop.xlane.xlu1 %1198 }
 0x480   :  { %2165 = vrcp.f32 %v1199_v17 }
 0x481   :  { %592 = vst.msk [vmem:[#allocation2] sm:$0xff] %vm430_vm2, %v591_v13  ;;  %2167 = vrcp.f32 %v1363_v8 }
 0x482   :  { %2169 = vrcp.f32 %v1535_v9 }
 0x483   :  { %2171 = vrcp.f32 %v1706_v16 }
 0x485   :  { %v2160_v12 = vpop.eup %2159 }
 0x486   :  { %v2162_v21 = vpop.eup %2161 }
 0x487   :  { %v2164_v25 = vpop.eup %2163 }
 0x48d   :  { %v2166_v29 = vpop.eup %2165 }
 0x48e   :  { %v2168_v35 = vpop.eup %2167 }
 0x48f   :  { %v2170_v42 = vpop.eup %2169 }
 0x490   :  { %v2172_v46 = vpop.eup %2171 }
 0x4ad   :  { %v754_v18 = vpop.f32.mrf.mxu1 }
 0x4ae   :  { %v759_v19 = vmul.f32 %v2160_v12, %v754_v18 }
 0x4af   :  { %v2051_v20 = vpop.f32.mrf.mxu1 }
 0x4b0   :  { %761 = vrot.lane.b32.xlu0 %v759_v19, %s2357_s29 }
 0x4b1   :  { %v926_v22 = vpop.f32.mrf.mxu1 }
 0x4b2   :  { %v931_v23 = vmul.f32 %v2162_v21, %v926_v22 }
 0x4b3   :  { %v2061_v24 = vpop.f32.mrf.mxu1 }
 0x4b4   :  { %933 = vrot.lane.b32.xlu1 %v931_v23, %s2368_s24 }
 0x4b5   :  { %v1098_v26 = vpop.f32.mrf.mxu1 }
 0x4b6   :  { %v1103_v27 = vmul.f32 %v2164_v25, %v1098_v26 }
 0x4b7   :  { %v2071_v28 = vpop.f32.mrf.mxu1 }
 0x4b8   :  { %1105 = vrot.lane.b32.xlu0 %v1103_v27, %s2369_s25 }
 0x4b9   :  { %v1269_v30 = vpop.f32.mrf.mxu1 }
 0x4ba   :  { %v1274_v31 = vmul.f32 %v2166_v29, %v1269_v30 }
 0x4bb   :  { %v2081_v32 = vpop.f32.mrf.mxu1 }
 0x4bc   :  { %1275 = vst.msk [vmem:[#allocation2 + $0x8] sm:$0xff] %vm430_vm2, %v1274_v31 }
 0x4bd   :  { %v1437_v36 = vpop.f32.mrf.mxu1 }
 0x4be   :  { %v1442_v38 = vmul.f32 %v2168_v35, %v1437_v36 }
 0x4bf   :  { %v2091_v39 = vpop.f32.mrf.mxu1 }
 0x4c0   :  { %1444 = vrot.lane.b32.xlu1 %v1442_v38, %s2357_s29 }
 0x4c1   :  { %v1608_v43 = vpop.f32.mrf.mxu1 }
 0x4c2   :  { %v1613_v44 = vmul.f32 %v2170_v42, %v1608_v43 }
 0x4c3   :  { %v2101_v45 = vpop.f32.mrf.mxu1 }
 0x4c4   :  { %1615 = vrot.lane.b32.xlu1 %v1613_v44, %s2368_s24 }
 0x4c5   :  { %v1779_v47 = vpop.f32.mrf.mxu1 }
 0x4c6   :  { %v1784_v48 = vmul.f32 %v2172_v46, %v1779_v47 }
 0x4c7   :  { %v2111_v49 = vpop.f32.mrf.mxu1 }
 0x4c8   :  { %1786 = vrot.lane.b32.xlu0 %v1784_v48, %s2369_s25 }
 0x522   :  { %v762_v50 = vpop.permute.xlu0 %761 }
 0x523   :  { %765 = vst.msk [vmem:[#allocation2] sm:$0xff] %vm764_vm5, %v762_v50 }
 0x526   :  { %v934_v51 = vpop.permute.xlu1 %933 }
 0x527   :  { %937 = vst.msk [vmem:[#allocation2] sm:$0xff] %vm936_vm6, %v934_v51 }
 0x52a   :  { %v1106_v52 = vpop.permute.xlu0 %1105 }
 0x52b   :  { %1109 = vst.msk [vmem:[#allocation2] sm:$0xff] %vm1108_vm7, %v1106_v52 }
 0x532   :  { %v1445_v53 = vpop.permute.xlu1 %1444  ;;  %v1790_v54 = vld [vmem:[#allocation2] sm:$0xff] }
 0x533   :  { %1447 = vst.msk [vmem:[#allocation2 + $0x8] sm:$0xff] %vm764_vm5, %v1445_v53  ;;  %2120 = vmatprep.mubr.msk.f32.mxu0 %vm152_vm0, %v1790_v54 }
 0x536   :  { %v1616_v55 = vpop.permute.xlu1 %1615 }
 0x537   :  { %1618 = vst.msk [vmem:[#allocation2 + $0x8] sm:$0xff] %vm936_vm6, %v1616_v55 }
 0x53a   :  { %v1787_v56 = vpop.permute.xlu0 %1786 }
 0x53b   :  { %1789 = vst.msk [vmem:[#allocation2 + $0x8] sm:$0xff] %vm1108_vm7, %v1787_v56 }
 0x542   :  { %v1791_v57 = vld [vmem:[#allocation2 + $0x8] sm:$0xff] }
 0x543   :  { %2121 = vmatmul.mubr.msk.f32.vlgmr.msra.gmra.mxu0 %vm152_vm0, %v1791_v57 }
 0x603   :  { %v2122_v59 = vpop.f32.mrf.mxu0 }
 0x604   :  { %v1881_v60 = vadd.f32 %v2122_v59, %v1940_v58 }
 0x605   :  { %v1875_v61 = vpop.f32.mrf.mxu0 }
 0x606   :  { %1885 = vst.msk [vmem:[#allocation17 + $0x8] sm:$0xff] %vm152_vm0, %v1881_v60  ;;  %v1876_v62 = vadd.f32 %v1940_v58, %v1875_v61 }
 0x608   :  { %1884 = vst.msk [vmem:[#allocation17] sm:$0xff] %vm152_vm0, %v1876_v62 }
 0x609   :  { %2332 = shalt.err (!%p2329_p11)
}
 0x60a   :  { %1897 = dma.vmem_to_hbm [thread:$0]  %s1892_s8, 256, %s2693_s12, [#allocation7], %s2356_s0, %s2356_s0, %s2357_s29  }
 0x60b   :  { %2351 = dma.done.wait [#allocation7], 256  }
 0x60c   :  { %2352 = vsyncadd [#allocation7], 4294967040 }
 0x60d   :  { %1901 = vsyncpa [#allocation6], 1 }
 0x60e   :  { %1902 = vsyncpa [#allocation9], 1 }
 0x60f   :  { %1903 = vsyncpa [#allocation12], 1 }
 0x610   :  { %1904 = vsyncpa [#allocation15], 1 }
 0x611   :  { %1905 = vsyncpa [#allocation7], 1 }

</bundles_post_ra>
